<compile_context>
chip_gen: v7x
topology: tpu7x:2x2x1
jax: 0.10.0
libtpu: 0.0.40
codegen_flags: <defaults>
</compile_context>

<pallas_src>
import math
import functools

import jax
import jax.numpy as jnp
from jax.experimental import pallas as pl
from jax.experimental.pallas import tpu as pltpu

FILL_VALUE = -9000000000000000.0


def _bigcn_kernel(x_ref, y_ref, wt_ref, bias_ref, z_ref, *, temperature,
                  compute_dtype, fold):
    # Per-grid-step tiles:
    #   x_ref    : (bt, n_x, D)
    #   y_ref    : (bt, n_y, D)
    #   wt_ref   : (D, D)                     shared across grid steps
    #   bias_ref : fold=False -> (bt, 1, n_x) additive mask bias (0 / FILL)
    #              fold=True  -> (1, bt*n_y, bt*n_x) block-diagonal bias
    #   z_ref    : (bt, n_y, D)
    bt, n_x, d = x_ref.shape
    n_y = y_ref.shape[1]
    cd = compute_dtype
    inv_t = 1.0 / temperature

    x = x_ref[...]
    y = y_ref[...]
    wt = wt_ref[...].astype(cd)

    # in_proj (Linear, no bias): fold all bt batch elements into one MXU pass.
    hx2 = jnp.dot(x.reshape(bt * n_x, d).astype(cd), wt,
                  preferred_element_type=jnp.float32)            # (bt*n_x, D)
    hy2 = jnp.dot(y.reshape(bt * n_y, d).astype(cd), wt,
                  preferred_element_type=jnp.float32)            # (bt*n_y, D)

    hx_c2 = hx2.astype(cd)
    hys_c2 = (hy2 * inv_t).astype(cd)   # 1/T folded into hy (n_y*D elements)

    if fold:
        # ---- block-diagonal batch fold: dense 2-D MXU matmuls -------------
        bias = bias_ref[0]                                # (bt*n_y, bt*n_x)
        # self score (f32 statistics; softmax is shift-invariant).
        a_yy = jnp.sum(hy2 * hy2, axis=-1, keepdims=True) * inv_t  # (bt*n_y,1)
        s = jnp.einsum('yd,xd->yx', hys_c2, hx_c2,
                       preferred_element_type=jnp.float32) + bias
        m = jnp.maximum(jnp.max(s, axis=-1, keepdims=True), a_yy)
        e = jnp.exp(s - m)                  # off-diagonal blocks -> exactly 0
        e_yy = jnp.exp(a_yy - m)
        denom = jnp.sum(e, axis=-1, keepdims=True) + e_yy
        inv = pl.reciprocal(denom, approx=True)           # EUP slot
        inv = inv * (2.0 - denom * inv)                   # Newton -> full f32
        # Deferred normalization: scale the (bt*n_y, D) result rows once.
        z1 = jnp.dot(e.astype(cd), hx_c2,
                     preferred_element_type=jnp.float32)  # (bt*n_y, D)
        zc = (z1 * inv).reshape(bt, n_y, d)
        # include_y broadcast term (normalized weights, per-batch sum over y).
        wyhy = ((e_yy * inv) * hy2).reshape(bt, n_y, d)
        z2 = jnp.sum(wyhy, axis=1, keepdims=True)         # (bt, 1, D)
        z_ref[...] = (zc + z2).astype(z_ref.dtype)
    else:
        # ---- per-batch einsum path (v5e-friendly, 128-wide MXU) -----------
        hx_c = hx_c2.reshape(bt, n_x, d)
        hys_c = hys_c2.reshape(bt, n_y, d)
        hy = hy2.reshape(bt, n_y, d)
        bias = bias_ref[...]                              # (bt, 1, n_x)
        a_yy = jnp.sum(hy * hy, axis=-1, keepdims=True) * inv_t   # (bt,n_y,1)
        s = jnp.einsum('byd,bxd->byx', hys_c, hx_c,
                       preferred_element_type=jnp.float32) + bias
        m = jnp.maximum(jnp.max(s, axis=-1, keepdims=True), a_yy)
        e = jnp.exp(s - m)
        e_yy = jnp.exp(a_yy - m)
        denom = jnp.sum(e, axis=-1, keepdims=True) + e_yy
        inv = pl.reciprocal(denom, approx=True)
        inv = inv * (2.0 - denom * inv)
        z1 = jnp.einsum('byx,bxd->byd', e.astype(cd), hx_c,
                        preferred_element_type=jnp.float32)
        z2 = jnp.sum((e_yy * inv) * hy, axis=1, keepdims=True)
        z_ref[...] = (z1 * inv + z2).astype(z_ref.dtype)


def _vmem_bytes_estimate(bt, n_x, n_y, d, in_bytes, fold):
    """Rough VMEM footprint: double-buffered blocks + live f32 intermediates."""
    blk = bt * (n_x + 2 * n_y) * d * in_bytes        # x, y, out blocks
    blk += d * d * in_bytes                          # wt
    blk += (bt * n_y * bt * n_x * 4) if fold else (bt * n_x * 4)   # bias
    dbuf = 2 * blk                                   # double-buffered pipeline
    scores = bt * n_y * (bt * n_x if fold else n_x) * 4
    live = 4 * bt * (n_x + n_y) * d                  # hx2, hy2 (f32)
    live += 2 * scores                               # s, e
    live += 3 * 4 * bt * n_y * d                     # z1 / zc / wyhy
    return dbuf + live


def _pick_bt(bs, n_x, n_y, d, in_bytes, fold, vmem_budget=24 << 20):
    """Largest divisor of bs that (a) fits the VMEM budget and (b) keeps the
    grid >= 2 steps so pipelining / v7x TC-sharding is possible."""
    best = 1
    for c in range(1, bs + 1):
        if bs % c:
            continue
        if _vmem_bytes_estimate(c, n_x, n_y, d, in_bytes, fold) > vmem_budget:
            continue
        if bs // c >= 2:
            best = c          # divisors ascend -> ends at largest bt with grid>=2
    return best


def _auto_fold():
    """Block-diagonal batch fold pays off on 256-wide MXUs (v6e/v7x); on
    128-wide generations (<= v5) per-batch matmuls are less wasteful."""
    try:
        kind = jax.devices()[0].device_kind.lower()
    except Exception:
        return True
    for old in ("v2", "v3", "v4", "v5"):
        if old in kind:
            return False
    return True


def bigcn_layer(x, y, wt, mask=None, *, compute_dtype=None, bt=None, fold=None):
    """Pallas implementation of BiGCNLayer.forward (dot_attn=True, include_y=True)."""
    bs, n_x, d = x.shape
    n_y = y.shape[1]
    if compute_dtype is None:
        # bf16 MXU operands on every TPU generation; accumulation and softmax
        # statistics stay f32 inside the kernel.
        compute_dtype = jnp.bfloat16
    if fold is None:
        fold = _auto_fold()
    in_bytes = jnp.dtype(x.dtype).itemsize
    if bt is None:
        bt = _pick_bt(bs, n_x, n_y, d, in_bytes, fold)
    assert bs % bt == 0, (bs, bt)
    n_steps = bs // bt
    temperature = float(math.sqrt(d))

    # Mask pre-converted to an additive bias (0 where kept, FILL where masked).
    if mask is None:
        col_bias = jnp.zeros((bs, n_x), jnp.float32)
    else:
        col_bias = jnp.where(mask.astype(jnp.float32).reshape(bs, n_x) > 0.5,
                             FILL_VALUE, 0.0).astype(jnp.float32)

    if fold:
        # Full (bt*n_y, bt*n_x) block-diagonal bias per grid step: diagonal
        # batch blocks carry the x-mask bias, off-diagonal blocks are FILL.
        same = jnp.arange(bt)[:, None] == jnp.arange(bt)[None, :]      # (bt,bt)
        cb = col_bias.reshape(n_steps, bt, n_x)
        bias5 = jnp.where(same[None, :, None, :, None],
                          cb[:, None, None, :, :], FILL_VALUE)
        bias = jnp.broadcast_to(bias5, (n_steps, bt, n_y, bt, n_x)).reshape(
            n_steps, bt * n_y, bt * n_x).astype(jnp.float32)
        bias_spec = pl.BlockSpec((1, bt * n_y, bt * n_x), lambda b: (b, 0, 0))
    else:
        bias = col_bias.reshape(bs, 1, n_x)
        bias_spec = pl.BlockSpec((bt, 1, n_x), lambda b: (b, 0, 0))

    # Advisory cost estimate so XLA overlaps this latency-bound call.
    flops = 2 * bs * (n_x + n_y) * d * d + 4 * bs * n_y * n_x * d
    if fold:
        flops += 4 * bs * (bt - 1) * n_y * n_x * d   # redundant off-diag blocks
    transcendentals = bs * n_y * (n_x + 2)
    bytes_accessed = int(x.nbytes + y.nbytes + wt.nbytes + bias.nbytes
                         + bs * n_y * d * in_bytes)
    cost = pl.CostEstimate(flops=int(flops),
                           transcendentals=int(transcendentals),
                           bytes_accessed=bytes_accessed)

    compiler_kwargs = dict(dimension_semantics=("parallel",))
    vmem_need = _vmem_bytes_estimate(bt, n_x, n_y, d, in_bytes, fold)
    if vmem_need > (16 << 20):
        # Only raise the scoped-VMEM limit when actually needed; cap for v7x.
        compiler_kwargs["vmem_limit_bytes"] = min(int(vmem_need * 3 // 2),
                                                  64 << 20)

    kernel = functools.partial(_bigcn_kernel, temperature=temperature,
                               compute_dtype=compute_dtype, fold=fold)
    out = pl.pallas_call(
        kernel,
        out_shape=jax.ShapeDtypeStruct((bs, n_y, d), x.dtype),
        grid_spec=pltpu.PrefetchScalarGridSpec(
            num_scalar_prefetch=0,
            grid=(n_steps,),
            in_specs=[
                pl.BlockSpec((bt, n_x, d), lambda b: (b, 0, 0)),
                pl.BlockSpec((bt, n_y, d), lambda b: (b, 0, 0)),
                pl.BlockSpec((d, d), lambda b: (0, 0)),
                bias_spec,
            ],
            out_specs=pl.BlockSpec((bt, n_y, d), lambda b: (b, 0, 0)),
        ),
        compiler_params=pltpu.CompilerParams(**compiler_kwargs),
        cost_estimate=cost,
    )(x, y, wt, bias)
    return out


def bigcn_layer_ref(x, y, wt, mask=None):
    """Pure-JAX reference mirroring the PyTorch module exactly."""
    bs, n_x, d = x.shape
    temperature = math.sqrt(d)
    hx = x @ wt
    hy = y @ wt
    a_xy = hx @ jnp.swapaxes(hy, 1, 2) / temperature             # (bs,n_x,n_y)
    if mask is not None:
        a_xy = jnp.where(mask[:, :, None] > 0.5, FILL_VALUE, a_xy)
    a_yy = jnp.sum(hy ** 2, axis=2) / temperature                # (bs,n_y)
    a = jnp.concatenate([a_xy, a_yy[:, None, :]], axis=1)        # (bs,n_x+1,n_y)
    a = jax.nn.softmax(a, axis=1)
    p_xy = a[:, :n_x, :]
    p_yy = a[:, n_x:, :]                                         # (bs,1,n_y)
    z = jnp.swapaxes(p_xy, 1, 2) @ hx + p_yy @ hy                # (bs,n_y,D)
    return z


def _make_case(key, bs, n_x, n_y, d):
    kx, ky, kw = jax.random.split(key, 3)
    x = jax.random.normal(kx, (bs, n_x, d), jnp.float32)
    y = jax.random.normal(ky, (bs, n_y, d), jnp.float32)
    # nn.Linear(in_size, in_size, bias=False): forward is h @ W.T -> pass Wt.
    w = jax.random.normal(kw, (d, d), jnp.float32) * (1.0 / math.sqrt(d))
    wt = w.T
    # mask: last quarter of x rows of batch 0 masked, other batches unmasked.
    mask = jnp.zeros((bs, n_x), jnp.float32).at[0, -(max(n_x // 4, 1)):].set(1.0)
    return x, y, wt, mask


if __name__ == "__main__":
    key = jax.random.PRNGKey(0)
    k1, k2 = jax.random.split(key)

    # --- small case (typical per-layer shapes); exercise both score paths ---
    x, y, wt, mask = _make_case(k1, bs=2, n_x=8, n_y=8, d=32)
    z_ref = bigcn_layer_ref(x, y, wt, mask)
    for fold in (False, True):
        z = jax.block_until_ready(
            bigcn_layer(x, y, wt, mask, compute_dtype=jnp.float32, fold=fold))
        assert z.shape == (2, 8, 32)
        assert jnp.allclose(z, z_ref, rtol=1e-4, atol=1e-4), (
            "f32 mismatch (small)", fold)

    # --- larger case: bt>1 per grid step, n_x != n_y, grid of 2 steps --------
    x2, y2, wt2, mask2 = _make_case(k2, bs=4, n_x=64, n_y=48, d=64)
    z2_ref = bigcn_layer_ref(x2, y2, wt2, mask2)
    for fold in (False, True):
        z2 = jax.block_until_ready(
            bigcn_layer(x2, y2, wt2, mask2, compute_dtype=jnp.float32, fold=fold))
        assert z2.shape == (4, 48, 64)
        assert jnp.allclose(z2, z2_ref, rtol=1e-4, atol=1e-4), (
            "f32 mismatch (large)", fold)

    # --- default production config: bf16 MXU operands, auto fold / bt -------
    # (bf16 rounding of the unnormalized exp weights is the dominant error.)
    z2_def = jax.block_until_ready(bigcn_layer(x2, y2, wt2, mask2))
    assert jnp.max(jnp.abs(z2_def - z2_ref)) < 0.25, "bf16 default path diverged"

    print("KERNEL_OK")
</pallas_src>

<mosaic_0001>
module attributes {stable_mosaic.version = 11 : i64} {
  func.func @_bigcn_kernel(%arg0: i32, %arg1: memref<1x8x32xf32, #tpu.memory_space<vmem>>, %arg2: memref<1x8x32xf32, #tpu.memory_space<vmem>>, %arg3: memref<32x32xf32, #tpu.memory_space<vmem>>, %arg4: memref<1x1x8xf32, #tpu.memory_space<vmem>>, %arg5: memref<1x8x32xf32, #tpu.memory_space<vmem>>) attributes {dimension_semantics = [#tpu.dimension_semantics<parallel>], iteration_bounds = array<i64: 2>, scalar_prefetch = 0 : i64, scratch_operands = 0 : i64, tpu.core_type = #tpu.core_type<tc>, window_params = [{transform_indices = @transform_0, window_bounds = array<i64: 1, 8, 32>}, {transform_indices = @transform_1, window_bounds = array<i64: 1, 8, 32>}, {pipeline_mode = #tpu.pipeline_mode<synchronous>, transform_indices = @transform_2, window_bounds = array<i64: 32, 32>}, {transform_indices = @transform_3, window_bounds = array<i64: 1, 1, 8>}, {transform_indices = @transform_4, window_bounds = array<i64: 1, 8, 32>}]} {
    %c0 = arith.constant 0 : index
    %c0_0 = arith.constant 0 : index
    %c0_1 = arith.constant 0 : index
    %0 = vector.load %arg1[%c0, %c0_0, %c0_1] : memref<1x8x32xf32, #tpu.memory_space<vmem>>, vector<1x8x32xf32>
    %c0_2 = arith.constant 0 : index
    %c0_3 = arith.constant 0 : index
    %c0_4 = arith.constant 0 : index
    %1 = vector.load %arg2[%c0_2, %c0_3, %c0_4] : memref<1x8x32xf32, #tpu.memory_space<vmem>>, vector<1x8x32xf32>
    %c0_5 = arith.constant 0 : index
    %c0_6 = arith.constant 0 : index
    %2 = vector.load %arg3[%c0_5, %c0_6] : memref<32x32xf32, #tpu.memory_space<vmem>>, vector<32x32xf32>
    %3 = vector.shape_cast %0 : vector<1x8x32xf32> to vector<8x32xf32>
    %cst = arith.constant dense<0.000000e+00> : vector<8x32xf32>
    %4 = tpu.matmul %3, %2, %cst {dimension_numbers = #tpu.dot_dimension_numbers<[1], [0], [0], [1], [0, 0, 1, 1], [], []>} : vector<8x32xf32>, vector<32x32xf32>, vector<8x32xf32> -> vector<8x32xf32>
    %5 = vector.shape_cast %1 : vector<1x8x32xf32> to vector<8x32xf32>
    %cst_7 = arith.constant dense<0.000000e+00> : vector<8x32xf32>
    %6 = tpu.matmul %5, %2, %cst_7 {dimension_numbers = #tpu.dot_dimension_numbers<[1], [0], [0], [1], [0, 0, 1, 1], [], []>} : vector<8x32xf32>, vector<32x32xf32>, vector<8x32xf32> -> vector<8x32xf32>
    %cst_8 = arith.constant 0.176776692 : f32
    %7 = vector.broadcast %cst_8 : f32 to vector<8x32xf32>
    %8 = arith.mulf %6, %7 : vector<8x32xf32>
    %9 = vector.shape_cast %4 : vector<8x32xf32> to vector<1x8x32xf32>
    %10 = vector.shape_cast %8 : vector<8x32xf32> to vector<1x8x32xf32>
    %11 = vector.shape_cast %6 : vector<8x32xf32> to vector<1x8x32xf32>
    %c0_9 = arith.constant 0 : index
    %c0_10 = arith.constant 0 : index
    %c0_11 = arith.constant 0 : index
    %12 = vector.load %arg4[%c0_9, %c0_10, %c0_11] : memref<1x1x8xf32, #tpu.memory_space<vmem>>, vector<1x1x8xf32>
    %13 = arith.mulf %11, %11 : vector<1x8x32xf32>
    %cst_12 = arith.constant dense<0.000000e+00> : vector<1x8xf32>
    %14 = vector.multi_reduction <add>, %13, %cst_12 [2] : vector<1x8x32xf32> to vector<1x8xf32>
    %15 = vector.shape_cast %14 : vector<1x8xf32> to vector<1x8x1xf32>
    %cst_13 = arith.constant 0.176776692 : f32
    %16 = vector.broadcast %cst_13 : f32 to vector<1x8x1xf32>
    %17 = arith.mulf %15, %16 : vector<1x8x1xf32>
    "tpu.trace_start"() <{level = 10 : i32, message = "byd,bxd->byx"}> : () -> ()
    %cst_14 = arith.constant dense<0.000000e+00> : vector<1x8x8xf32>
    %18 = tpu.matmul %10, %9, %cst_14 {dimension_numbers = #tpu.dot_dimension_numbers<[2], [2], [1], [1], [0, 0, 0, 1, 1, 1], [0], [0]>} : vector<1x8x32xf32>, vector<1x8x32xf32>, vector<1x8x8xf32> -> vector<1x8x8xf32>
    "tpu.trace_stop"() : () -> ()
    %19 = vector.broadcast %12 : vector<1x1x8xf32> to vector<1x8x8xf32>
    %20 = arith.addf %18, %19 : vector<1x8x8xf32>
    %cst_15 = arith.constant dense<0xFF800000> : vector<1x8xf32>
    %21 = vector.multi_reduction <maximumf>, %20, %cst_15 [2] : vector<1x8x8xf32> to vector<1x8xf32>
    %22 = vector.shape_cast %21 : vector<1x8xf32> to vector<1x8x1xf32>
    %23 = arith.maximumf %22, %17 : vector<1x8x1xf32>
    %24 = vector.broadcast %23 : vector<1x8x1xf32> to vector<1x8x8xf32>
    %25 = arith.subf %20, %24 : vector<1x8x8xf32>
    %26 = math.exp %25 : vector<1x8x8xf32>
    %27 = arith.subf %17, %23 : vector<1x8x1xf32>
    %28 = math.exp %27 : vector<1x8x1xf32>
    %cst_16 = arith.constant dense<0.000000e+00> : vector<1x8xf32>
    %29 = vector.multi_reduction <add>, %26, %cst_16 [2] : vector<1x8x8xf32> to vector<1x8xf32>
    %30 = vector.shape_cast %29 : vector<1x8xf32> to vector<1x8x1xf32>
    %31 = arith.addf %30, %28 : vector<1x8x1xf32>
    %32 = tpu.reciprocal %31 {approx = true} : vector<1x8x1xf32> -> vector<1x8x1xf32>
    %33 = arith.mulf %31, %32 : vector<1x8x1xf32>
    %cst_17 = arith.constant 2.000000e+00 : f32
    %34 = vector.broadcast %cst_17 : f32 to vector<1x8x1xf32>
    %35 = arith.subf %34, %33 : vector<1x8x1xf32>
    %36 = arith.mulf %32, %35 : vector<1x8x1xf32>
    "tpu.trace_start"() <{level = 10 : i32, message = "byx,bxd->byd"}> : () -> ()
    %cst_18 = arith.constant dense<0.000000e+00> : vector<1x8x32xf32>
    %37 = tpu.matmul %26, %9, %cst_18 {dimension_numbers = #tpu.dot_dimension_numbers<[2], [1], [1], [2], [0, 0, 0, 1, 1, 2], [0], [0]>} : vector<1x8x8xf32>, vector<1x8x32xf32>, vector<1x8x32xf32> -> vector<1x8x32xf32>
    "tpu.trace_stop"() : () -> ()
    %38 = arith.mulf %28, %36 : vector<1x8x1xf32>
    %39 = vector.broadcast %38 : vector<1x8x1xf32> to vector<1x8x32xf32>
    %40 = arith.mulf %39, %11 : vector<1x8x32xf32>
    %cst_19 = arith.constant dense<0.000000e+00> : vector<1x32xf32>
    %41 = vector.multi_reduction <add>, %40, %cst_19 [1] : vector<1x8x32xf32> to vector<1x32xf32>
    %42 = vector.shape_cast %41 : vector<1x32xf32> to vector<1x1x32xf32>
    %43 = vector.broadcast %36 : vector<1x8x1xf32> to vector<1x8x32xf32>
    %44 = arith.mulf %37, %43 : vector<1x8x32xf32>
    %45 = vector.broadcast %42 : vector<1x1x32xf32> to vector<1x8x32xf32>
    %46 = arith.addf %44, %45 : vector<1x8x32xf32>
    %c0_20 = arith.constant 0 : index
    %c0_21 = arith.constant 0 : index
    %c0_22 = arith.constant 0 : index
    %47 = vector.load %arg5[%c0_20, %c0_21, %c0_22] : memref<1x8x32xf32, #tpu.memory_space<vmem>>, vector<1x8x32xf32>
    tpu.vector_store %arg5[%c0_20, %c0_21, %c0_22], %46 {strides = array<i32>} : memref<1x8x32xf32, #tpu.memory_space<vmem>>, vector<1x8x32xf32>,
    return
  }
  func.func @transform_0(%arg0: i32) -> (i32, i32, i32) {
    %c0_i32 = arith.constant 0 : i32
    %c0_i32_0 = arith.constant 0 : i32
    %c0_i32_1 = arith.constant 0 : i32
    return %arg0, %c0_i32, %c0_i32_0 : i32, i32, i32
  }
  func.func @transform_1(%arg0: i32) -> (i32, i32, i32) {
    %c0_i32 = arith.constant 0 : i32
    %c0_i32_0 = arith.constant 0 : i32
    %c0_i32_1 = arith.constant 0 : i32
    return %arg0, %c0_i32, %c0_i32_0 : i32, i32, i32
  }
  func.func @transform_2(%arg0: i32) -> (i32, i32) {
    %c0_i32 = arith.constant 0 : i32
    %c0_i32_0 = arith.constant 0 : i32
    %c0_i32_1 = arith.constant 0 : i32
    return %c0_i32, %c0_i32_0 : i32, i32
  }
  func.func @transform_3(%arg0: i32) -> (i32, i32, i32) {
    %c0_i32 = arith.constant 0 : i32
    %c0_i32_0 = arith.constant 0 : i32
    %c0_i32_1 = arith.constant 0 : i32
    return %arg0, %c0_i32, %c0_i32_0 : i32, i32, i32
  }
  func.func @transform_4(%arg0: i32) -> (i32, i32, i32) {
    %c0_i32 = arith.constant 0 : i32
    %c0_i32_0 = arith.constant 0 : i32
    %c0_i32_1 = arith.constant 0 : i32
    return %arg0, %c0_i32, %c0_i32_0 : i32, i32, i32
  }
}

</mosaic_0001>

<bundles_post_ra>
// kernel: tpu_custom_call.1
= control target key start
LH: loop header
LB: loop body
LE: loop exit
PB: predicated region body
PF: predicated region fallthrough
CT: control target
= control target key end

     0   :  { %s1352_s0 = inlined_call_operand.hbm [shape: f32[2,8,32], index: 0, kind: input, shape index: {}]   ;;  %s1353_s1 = inlined_call_operand.hbm [shape: f32[2,8,32], index: 1, kind: input, shape index: {}]   ;;  %s1354_s2 = inlined_call_operand.hbm [shape: f32[32,32], index: 2, kind: input, shape index: {}]   ;;  %s1355_s3 = inlined_call_operand.vmem [shape: f32[2,1,8], index: 3, kind: input, shape index: {}]   ;;  %s1356_s4 = inlined_call_operand.hbm [shape: f32[2,8,32], index: 4, kind: output, shape index: {}]  }
   0x1   :  { %1361 = sst [smem:[#allocation13_spill]] %s1354_s2 }
   0x2   :  { %9 = vsyncpa [#allocation3], 0 }
   0x3   :  { %11 = vsyncpa [#allocation3 + $0x1], 0 }
   0x4   :  { %12 = vsyncpa [#allocation6], 0 }
   0x5   :  { %14 = vsyncpa [#allocation6 + $0x1], 0 }
   0x6   :  { %15 = vsyncpa [#allocation4], 0 }
   0x7   :  { %17 = vsyncpa [#allocation4 + $0x1], 0  ;;  %s1101_s15 = smov 0   ;;  %s1103_s16 = smov 0  }
   0x8   :  { %s1105_s17 = smov 0   ;;  %s1107_s18 = smov 0  }
   0x9 LB: > { %s1122_s19 = sadd.s32 4294967295, %s1065_s18   ;;  %s749_s20 = sadd.s32 4294967294, %s1065_s18   ;;  %s1065_s18 = sphi %s1107_s18, %s1380_s18   ;;  %s1061_s17 = sphi %s1105_s17, %s1379_s17   ;;  %s1057_s16 = sphi %s1103_s16, %s1378_s16   ;;  %s1053_s15 = sphi %s1101_s15, %s1377_s15  }
   0xa   : > { %p43_p0 = scmp.ne.s32.totalorder %s1057_s16, %s1053_s15  ;;  %p1357_p1 = scmp.eq.s32.totalorder %s1122_s19, 0 }
   0xb   : > { %p146_p3 = scmp.eq.s32.totalorder %s749_s20, 1  ;;  %p750_p5 = scmp.ge.s32.totalorder %s1065_s18, 1 }
   0xc   : > { %p1131_p4 = por %p1357_p1, %p43_p0  ;;  %p153_p7 = scmp.lt.s32.totalorder %s1065_s18, 3 }
   0xd   : > { %p1136_p6 = por %p146_p3, %p43_p0  ;;  %s1067_s24 = smov [#allocation7]  }
   0xe   : > { %s1362_s21 = scalar_select %p1131_p4, 1, 0 }
   0xf   : > { %s1363_s22 = scalar_select %p1136_p6, 1, 0 }
  0x10   : > { %p1141_p8 = pnand %p750_p5, %p153_p7  ;;  %s165_s25 = sshll.u32 %s1067_s24, 4  ;;  %s1145_s25 = int_to_ptr.vmem [resolvable:$true] %s165_s25 }
  0x11   : > { %s1157_s27 = sadd.s32 1, %s1065_s18   ;;  %s30_s28 = sadd.s32 1, %s1061_s17 }
  0x12   : > { %s1364_s23 = scalar_select %p1141_p8, 1, 0 }
  0x13   : > { %p840_p9 = pneg %p1141_p8  ;;  %s27_s29 = ssub.s32 %s1065_s18, %s1157_s27 }
  0x14   : > { %s1366_s2 = sld [smem:[#allocation13_spill]] }
  0x15   : > { %p1152_p11 = pnand %p840_p9, %p1357_p1 }
  0x17   : > { %p905_p13 = pneg %p1152_p11 }
  0x1a   : > { %s903_s6 = scalar_lea.hbm %s1366_s2, 512 }
  0x1b   : > { %p904_p12 = scmp.ne.s32.totalorder %s1366_s2, %s903_s6  ;;  %p910_p5 = scmp.lt.u32.totalorder %s903_s6, %s1366_s2 }
  0x1d   : > { %p906_p0 = pnand %p905_p13, %p904_p12 }
  0x1f   : > { %p907_p3 = pneg %p906_p0 }
  0x21   : > { %p912_p7 = pnand %p910_p5, %p907_p3 }
  0x23   : > { %915 = shalt.err (!%p912_p7)
}
  0x24   : > { %s916_s11 = scalar_lea.vmem %s1145_s25, 512  ;;  %p924_p2 = scmp.lt.s32.totalorder %s1145_s25, %s1145_s25 }
  0x25   : > { %p917_p9 = scmp.ne.s32.totalorder %s1145_s25, %s916_s11  ;;  %p925_p6 = scmp.lt.s32.totalorder %s916_s11, %s916_s11 }
  0x27   : > { %p919_p10 = pnand %p917_p9, %p905_p13  ;;  %p926_p4 = por %p925_p6, %p924_p2 }
  0x29   : > { %p920_p1 = pneg %p919_p10 }
  0x2b   : > { %p927_p8 = pnand %p926_p4, %p920_p1 }
  0x2d   : > { %930 = shalt.err (!%p927_p8)
}
  0x2e   : > { %s1068_s12 = smov 128   ;;  %s1069_s13 = smov 8  }
  0x2f   : > { %843 = dma.hbm_to_vmem [thread:$0]  (!%p1152_p11), %s1366_s2, 512, %s1145_s25, [#allocation6], %s1068_s12, %s1068_s12, %s1069_s13  }
  0x30   : > { %p28_p2 = scmp.eq.s32.totalorder %s27_s29, 0  ;;  %p37_p1 = scmp.ne.s32.totalorder %s1061_s17, %s1057_s16 }
  0x31   : > { %p38_p4 = scmp.eq.s32.totalorder %s1065_s18, 0  ;;  %p856_p6 = scmp.lt.s32.totalorder %s1065_s18, 2 }
  0x32   : > { %s1188_s24 = scalar_select %p28_p2, %s1061_s17, %s30_s28  }
  0x33   : > { %p39_p8 = por %p38_p4, %p37_p1  ;;  %p1367_p10 = scmp.eq.s32.totalorder %s1122_s19, 1 }
  0x34   : > { %s179_s5 = sand.u32 1, %s1061_s17   ;;  %s754_s6 = sshll.u32 %s1065_s18, 7 }
  0x35   : > { %p1192_p12 = por %p1367_p10, %p37_p1  ;;  %s1198_s7 = sshll.u32 %s179_s5, 3 }
  0x36   : > { %s1203_s25 = scalar_lea.hbm %s1352_s0, %s754_s6  ;;  %s183_s28 = scalar_lea.vmem [#allocation2], %s1198_s7 }
  0x37   : > { %s1368_s30 = scalar_select %p1192_p12, 1, 0 }
  0x38   : > { %s190_s29 = sshll.u32 %s183_s28, 4  ;;  %p1206_p11 = pnand %p856_p6, %p39_p8  ;;  %s1210_s29 = int_to_ptr.vmem [resolvable:$true] %s190_s29 }
  0x39   : > { %s1215_s12 = scalar_lea.hbm %s1353_s1, %s754_s6  ;;  %s180_s13 = scalar_lea.sflag [#allocation3], %s179_s5 }
  0x3a   : > { %s931_s14 = scalar_lea.hbm %s1203_s25, 128  ;;  %p933_p0 = pneg %p1206_p11 }
  0x3b   : > { %p932_p13 = scmp.ne.s32.totalorder %s1203_s25, %s931_s14  ;;  %s936_s8 = scalar_lea.hbm %s1352_s0, 256 }
  0x3c   : > { %p937_p7 = scmp.lt.u32.totalorder %s1203_s25, %s1352_s0  ;;  %p938_p9 = scmp.lt.u32.totalorder %s936_s8, %s931_s14 }
  0x3d   : > { %p934_p3 = pnand %p933_p0, %p932_p13  ;;  %p940_p1 = scmp.lt.u32.totalorder %s931_s14, %s1203_s25 }
  0x3e   : > { %p939_p2 = por %p938_p9, %p937_p7 }
  0x3f   : > { %p935_p5 = pneg %p934_p3 }
  0x40   : > { %p941_p4 = por %p940_p1, %p939_p2 }
  0x42   : > { %p942_p6 = pnand %p941_p4, %p935_p5 }
  0x44   : > { %945 = shalt.err (!%p942_p6)
}
  0x45   : > { %s946_s5 = scalar_lea.vmem %s1210_s29, 128  ;;  %s1070_s6 = smov [#allocation2]  }
  0x46   : > { %p947_p8 = scmp.ne.s32.totalorder %s1210_s29, %s946_s5  ;;  %s951_s10 = sshll.u32 %s1070_s6, 4  ;;  %s952_s10 = int_to_ptr.vmem [resolvable:$false] %s951_s10 }
  0x47   : > { %s953_s2 = scalar_lea.vmem %s952_s10, 256  ;;  %p954_p3 = scmp.lt.s32.totalorder %s1210_s29, %s952_s10 }
  0x48   : > { %p949_p10 = pnand %p947_p8, %p933_p0  ;;  %p955_p7 = scmp.lt.s32.totalorder %s953_s2, %s946_s5 }
  0x4a   : > { %p950_p13 = pneg %p949_p10  ;;  %p956_p9 = por %p955_p7, %p954_p3 }
  0x4c   : > { %p957_p2 = pnand %p956_p9, %p950_p13 }
  0x4e   : > { %960 = shalt.err (!%p957_p2)
}
  0x4f   : > { %847 = dma.hbm_to_vmem [thread:$0]  (!%p1206_p11), %s1203_s25, 128, %s1210_s29, %s180_s13  }
  0x50   : > { %s197_s11 = sand.u32 1, %s1065_s18   ;;  %s201_s14 = scalar_lea.vmem [#allocation5], %s1198_s7 }
  0x51   : > { %s208_s20 = sshll.u32 %s201_s14, 4  ;;  %s198_s26 = scalar_lea.sflag [#allocation6], %s197_s11  ;;  %s209_s20 = int_to_ptr.vmem [resolvable:$true] %s208_s20 }
  0x52   : > { %s961_s8 = scalar_lea.hbm %s1215_s12, 128  ;;  %s966_s6 = scalar_lea.hbm %s1353_s1, 256 }
  0x53   : > { %p962_p5 = scmp.ne.s32.totalorder %s1215_s12, %s961_s8  ;;  %p967_p6 = scmp.lt.u32.totalorder %s1215_s12, %s1353_s1 }
  0x54   : > { %p968_p8 = scmp.lt.u32.totalorder %s966_s6, %s961_s8  ;;  %p970_p13 = scmp.lt.u32.totalorder %s961_s8, %s1215_s12 }
  0x55   : > { %p964_p1 = pnand %p962_p5, %p933_p0 }
  0x56   : > { %p969_p10 = por %p968_p8, %p967_p6 }
  0x57   : > { %p965_p4 = pneg %p964_p1 }
  0x58   : > { %p971_p3 = por %p970_p13, %p969_p10 }
  0x5a   : > { %p972_p7 = pnand %p971_p3, %p965_p4 }
  0x5c   : > { %975 = shalt.err (!%p972_p7)
}
  0x5d   : > { %s976_s7 = scalar_lea.vmem %s209_s20, 128  ;;  %s1071_s25 = smov [#allocation5]  }
  0x5e   : > { %p977_p9 = scmp.ne.s32.totalorder %s209_s20, %s976_s7  ;;  %s981_s29 = sshll.u32 %s1071_s25, 4  ;;  %s982_s29 = int_to_ptr.vmem [resolvable:$false] %s981_s29 }
  0x5f   : > { %s983_s13 = scalar_lea.vmem %s982_s29, 256  ;;  %p984_p1 = scmp.lt.s32.totalorder %s209_s20, %s982_s29 }
  0x60   : > { %p979_p2 = pnand %p977_p9, %p933_p0  ;;  %p985_p12 = scmp.lt.s32.totalorder %s983_s13, %s976_s7 }
  0x62   : > { %p980_p5 = pneg %p979_p2  ;;  %p986_p6 = por %p985_p12, %p984_p1 }
  0x64   : > { %p987_p8 = pnand %p986_p6, %p980_p5 }
  0x66   : > { %990 = shalt.err (!%p987_p8)
}
  0x67   : > { %850 = dma.hbm_to_vmem [thread:$0]  (!%p1206_p11), %s1215_s12, 128, %s209_s20, %s198_s26  }
  0x68   : > { %p1370_p4 = scmp.ne.s32.totalorder %s1364_s23, 0 }
  0x69   : > { %s1266_s11 = sand.u32 (!%p1370_p4), 1, %s1057_s16   ;;  %p1371_p12 = scmp.ne.s32.totalorder (!%p1370_p4), %s1362_s21, 0 }
  0x6a   : > { %223 = sbr.rel (%p1370_p4) target bundleno = 949 (0x3b5), region = 36  ;;  %s1269_s14 = sshll.u32 (!%p1370_p4), %s1266_s11, 3 }
  0x6b   : > { %s226_s8 = scalar_lea.sflag (!%p1370_p4), [#allocation3], %s1266_s11  ;;  %s229_s28 = scalar_lea.vmem (!%p1370_p4), [#allocation2], %s1269_s14 }
  0x71   : > { %1036 = dma.done.wait (%p1371_p12), %s226_s8, 128  }
  0x72   : > { %1038 = vsyncadd (%p1371_p12), %s226_s8, 4294967168  ;;  %s234_s23 = sand.u32 1, %s1122_s19   ;;  %s238_s12 = scalar_lea.vmem [#allocation5], %s1269_s14 }
  0x73   : > { %s235_s9 = scalar_lea.sflag [#allocation6], %s234_s23 }
  0x74   : > { %1040 = dma.done.wait (%p1371_p12), %s235_s9, 128  }
  0x75   : > { %1042 = vsyncadd (%p1371_p12), %s235_s9, 4294967168  ;;  %p1372_p11 = scmp.eq.s32.totalorder %s1122_s19, 0 }
  0x77   : > { %1044 = dma.done.wait (%p1372_p11), [#allocation6], 512   ;;  %p1373_p0 = pmov %p1372_p11 }
  0x78   : > { %v1072_v0 = vmov 0.0|0.0   ;;  %vm1073_vm0 = vmmov 0   ;;  %v1074_v1 = vmov 0.0   ;;  %v280_v2 = vld [vmem:[#allocation7] sm:$0xff]  ;;  %v281_v3 = vld [vmem:[#allocation7 + $0x8] sm:$0xff]  ;;  %v282_v4 = vld [vmem:[#allocation7 + $0x10] sm:$0xff] }
  0x79   : > { %1046 = vsyncadd (%p1373_p0), [#allocation6], 4294966784  ;;  %818 = vmatprep.subr.bf16.mxu0 %v1072_v0  ;;  %824 = vmatprep.subr.bf16.mxu1 %v1072_v0  ;;  %v819_v5 = vpack.c.bf16 %v281_v3, %v280_v2  ;;  %v283_v6 = vld [vmem:[#allocation7 + $0x18] sm:$0xff]  ;;  %v278_v8 = vld [vmem:[%s229_s28] sm:$0xff]  ;;  %vm284_vm1 = vcmask 261120   ;;  %p275_p10 = scmp.lt.s32.totalorder %s1122_s19, 1 }
  0x7a   : > { %794 = vmatprep.mubr.msk.f32.mxu0 %vm1073_vm0, %v1074_v1  ;;  %805 = vmatprep.mubr.msk.f32.mxu1 %vm1073_vm0, %v1074_v1  ;;  %v822_v7 = vpack.c.bf16 %v283_v6, %v282_v4  ;;  %v279_v9 = vld [vmem:[%s238_s12] sm:$0xff]  ;;  %vm520_vm2 = vcmask 64512   ;;  %s769_s6 = sshll.u32 %s1122_s19, 7  ;;  %s274_s10 = scalar_lea.vmem [#allocation8], %s1269_s14 }
  0x7b   : > { %820 = vmatpush3.bf16.msra.mxu0 %v819_v5  ;;  %826 = vmatpush3.bf16.msra.mxu1 %v819_v5  ;;  %s276_s21 = scalar_select %p275_p10, %s1122_s19, 1 }
  0x7c   : > { %821 = vmatprep.subr.bf16.mxu0 %v1072_v0  ;;  %827 = vmatprep.subr.bf16.mxu1 %v1072_v0  ;;  %s638_s2 = sshll.u32 %s274_s10, 4  ;;  %s1307_s29 = scalar_lea.hbm %s1356_s4, %s769_s6  ;;  %s1309_s2 = int_to_ptr.vmem [resolvable:$true] %s638_s2 }
  0x7d   : > { %s277_s5 = scalar_lea.vmem %s1355_s3, %s276_s21  ;;  %s625_s13 = scalar_lea.sflag [#allocation4], %s1266_s11 }
  0x7e   : > { %v764_v17 = vld [vmem:[%s277_s5] ss:$0 sm:$0xff]  ;;  %s991_s19 = scalar_lea.vmem %s1309_s2, 128  ;;  %p1374_p3 = scmp.ne.s32.totalorder %s1368_s30, 0 }
  0x7f   : > { %823 = vmatpush3.bf16.msra.mxu0 %v822_v7  ;;  %829 = vmatpush3.bf16.msra.mxu1 %v822_v7  ;;  %p992_p13 = scmp.ne.s32.totalorder %s1309_s2, %s991_s19  ;;  %s1075_s14 = smov [#allocation8]  }
  0x80   : > { %808 = vmatprep.subr.mxu0 %v1074_v1  ;;  %813 = vmatprep.subr.mxu1 %v1074_v1  ;;  %s995_s8 = sshll.u32 %s1075_s14, 4  ;;  %s996_s8 = int_to_ptr.vmem [resolvable:$false] %s995_s8 }
  0x81   : > { %p993_p7 = pnand %p992_p13, %p1374_p3  ;;  %s997_s28 = scalar_lea.vmem %s996_s8, 256 }
  0x82   : > { %795 = vmatmul.mubr.msk.f32.vlgmr.msra.gmra.mrb[0].mxu0 %vm284_vm1, %v278_v8  ;;  %806 = vmatmul.mubr.msk.f32.vlgmr.msra.gmra.mrb[0].mxu1 %vm284_vm1, %v279_v9  ;;  %p998_p2 = scmp.lt.s32.totalorder %s1309_s2, %s996_s8  ;;  %p999_p5 = scmp.lt.s32.totalorder %s997_s28, %s991_s19 }
  0x83   : > { %810 = vmatprep.mubr.msk.f32.mxu0 %vm1073_vm0, %v1074_v1  ;;  %815 = vmatprep.mubr.msk.f32.mxu1 %vm1073_vm0, %v1074_v1  ;;  %p994_p9 = pneg %p993_p7 }
  0x84   : > { %p1000_p1 = por %p999_p5, %p998_p2 }
  0x86   : > { %p1001_p6 = pnand %p1000_p1, %p994_p9 }
 0x155   : > { %v354_v10 = vpop.f32.mrb[0].mxu0  ;;  %v427_v11 = vpop.f32.mrb[0].mxu1 }
 0x156   : > { %v796_v12 = vpop.f32.mrb[1].mxu0  ;;  %v431_v13 = vmul.f32 0.17677669, %v427_v11  ;;  %809 = vmatpush3.xpose.msk.msra.mxu0 %vm284_vm1, %v354_v10  ;;  %814 = vmatpush3.msra.mxu1 %v354_v10  ;;  %v807_v14 = vpop.f32.mrb[1].mxu1  ;;  %v433_v15 = vmul.f32 %v427_v11, %v427_v11 }
 0x158   : > { %v434_v16 = vsel %vm284_vm1, %v433_v15, 0.0 }
 0x159   : > { %811 = vmatmul.mubr.msk.f32.vlgmr.msra.gmra.mrb[2].mxu0 %vm284_vm1, %v431_v13  ;;  %435 = vadd.xlane.f32.xlu0 %v434_v16 }
 0x1e6   : > { %v436_v22 = vpop.xlane.xlu0 %435 }
 0x1e7   : > { %v437_v23 = vmul.f32 0.17677669, %v436_v22 }
 0x22c   : > { %v516_v18 = vpop.f32.mrb[2].mxu0 }
 0x22d   : > { %v517_v19 = vadd.f32 %v764_v17, %v516_v18  ;;  %v812_v20 = vpop.f32.mrb[3].mxu0 }
 0x22f   : > { %v521_v21 = vsel %vm520_vm2, %v517_v19, -inf }
 0x230   : > { %522 = vmax.xlane.f32.xlu0 %v521_v21 }
 0x2bd   : > { %v523_v24 = vpop.xlane.xlu0 %522 }
 0x2be   : > { %v524_v25 = vmax.f32 %v523_v24, %v437_v23 }
 0x2c0   : > { %v525_v26 = vsub.f32 %v517_v19, %v524_v25  ;;  %v528_v27 = vsub.f32 %v437_v23, %v524_v25 }
 0x2c2   : > { %v526_v28 = vmul.f32 1.442695, %v525_v26  ;;  %v529_v31 = vmul.f32 1.442695, %v528_v27 }
 0x2c4   : > { %897 = vpow2.f32 %v526_v28 }
 0x2c5   : > { %899 = vpow2.f32 %v529_v31 }
 0x2ce   : > { %v898_v29 = vpop.eup %897 }
 0x2cf   : > { %816 = vmatmul.mubr.msk.f32.vlgmr.msra.gmra.mrb[2].mxu1 %vm520_vm2, %v898_v29  ;;  %v531_v30 = vsel %vm520_vm2, %v898_v29, 0.0  ;;  %v900_v32 = vpop.eup %899 }
 0x2d0   : > { %532 = vadd.xlane.f32.xlu1 %v531_v30 }
 0x35d   : > { %v533_v33 = vpop.xlane.xlu1 %532 }
 0x35e   : > { %v534_v34 = vadd.f32 %v900_v32, %v533_v33 }
 0x360   : > { %901 = vrcp.f32 %v534_v34 }
 0x36a   : > { %v902_v35 = vpop.eup %901 }
 0x36b   : > { %v536_v36 = vmul.f32 %v902_v35, %v534_v34 }
 0x36d   : > { %v537_v37 = vsub.f32 2.0, %v536_v36 }
 0x36f   : > { %v538_v38 = vmul.f32 %v902_v35, %v537_v37 }
 0x371   : > { %v612_v39 = vmul.f32 %v900_v32, %v538_v38 }
 0x373   : > { %v613_v40 = vmul.f32 %v612_v39, %v427_v11 }
 0x375   : > { %v614_v41 = vsel %vm284_vm1, %v613_v40, 0.0 }
 0x376   : > { %v615_v42 = vrot.slane %v614_v41, 4 }
 0x378   : > { %v616_v43 = vadd.f32 %v615_v42, %v614_v41 }
 0x37a   : > { %v617_v44 = vrot.slane %v616_v43, 2 }
 0x37c   : > { %v618_v45 = vadd.f32 %v617_v44, %v616_v43 }
 0x37e   : > { %v619_v46 = vrot.slane %v618_v45, 1 }
 0x380   : > { %v620_v48 = vadd.f32 %v619_v46, %v618_v45 }
 0x3a2   : > { %v608_v47 = vpop.f32.mrb[2].mxu1 }
 0x3a3   : > { %v621_v49 = vmul.f32 %v608_v47, %v538_v38  ;;  %v817_v50 = vpop.f32.mrb[3].mxu1 }
 0x3a5   : > { %v622_v51 = vadd.f32 %v621_v49, %v620_v48 }
 0x3a7   : > { %623 = vst.msk [vmem:[%s274_s10] sm:$0xff] %vm284_vm1, %v622_v51 }
 0x3a8   : > { %1004 = shalt.err (!%p1001_p6)
}
 0x3a9   : > { %s1005_s11 = scalar_lea.hbm %s1307_s29, 128  ;;  %s1009_s12 = scalar_lea.hbm %s1356_s4, 256 }
 0x3aa   : > { %p1006_p8 = scmp.ne.s32.totalorder %s1307_s29, %s1005_s11  ;;  %p1010_p11 = scmp.lt.u32.totalorder %s1307_s29, %s1356_s4 }
 0x3ab   : > { %p1011_p0 = scmp.lt.u32.totalorder %s1009_s12, %s1005_s11  ;;  %p1013_p13 = scmp.lt.u32.totalorder %s1005_s11, %s1307_s29 }
 0x3ac   : > { %p1007_p4 = pnand %p1006_p8, %p1374_p3 }
 0x3ad   : > { %p1012_p10 = por %p1011_p0, %p1010_p11 }
 0x3ae   : > { %p1008_p12 = pneg %p1007_p4 }
 0x3af   : > { %p1014_p7 = por %p1013_p13, %p1012_p10 }
 0x3b1   : > { %p1015_p9 = pnand %p1014_p7, %p1008_p12 }
 0x3b3   : > { %1018 = shalt.err (!%p1015_p9)
}
 0x3b4   : > { %838 = dma.vmem_to_hbm [thread:$0]  (%p1374_p3), %s1309_s2, 128, %s1307_s29, %s625_s13  }
 0x3b5 PF: > { %s650_s26 = sand.u32 1, %s1053_s15   ;;  %p1375_p2 = scmp.ne.s32.totalorder %s1363_s22, 0 }
 0x3b6   : > { %p1376_p5 = scmp.ge.s32.totalorder %s1065_s18, 2  ;;  %s651_s5 = scalar_lea.sflag [#allocation4], %s650_s26 }
 0x3b8   : > { %p852_p1 = pnand %p1376_p5, %p1375_p2 }
 0x3ba   : > { %1048 = dma.done.wait (!%p852_p1), %s651_s5, 128  }
 0x3bb   : > { %1050 = vsyncadd (!%p852_p1), %s651_s5, 4294967168  ;;  %p20_p6 = scmp.ge.s32.totalorder %s1157_s27, 4   ;;  %s1377_s15 = smov %s1057_s16 }
 0x3bc   : > { %s1378_s16 = smov %s1061_s17  ;;  %s1379_s17 = smov %s1188_s24 }
 0x3bd   : > { %s1380_s18 = smov %s1157_s27  ;;  %22 = sbr.rel (!%p20_p6) target bundleno = 9 (0x9), region = 101 }
 0x3c4   :  { %656 = vsyncpa [#allocation3], 1 }
 0x3c5   :  { %658 = vsyncpa [#allocation3 + $0x1], 1 }
 0x3c6   :  { %659 = vsyncpa [#allocation6], 1 }
 0x3c7   :  { %661 = vsyncpa [#allocation6 + $0x1], 1 }
 0x3c8   :  { %662 = vsyncpa [#allocation4], 1 }
 0x3c9   :  { %664 = vsyncpa [#allocation4 + $0x1], 1 }

</bundles_post_ra>
